<compile_context>
chip_gen: v7x
topology: tpu7x:2x2x1
jax: 0.10.0
libtpu: 0.0.40
codegen_flags: <defaults>
</compile_context>

<pallas_src>
import functools

import jax
import jax.numpy as jnp
from jax.experimental import pallas as pl
from jax.experimental.pallas import tpu as pltpu

LANE = 128
SUBLANE = 8


def _round_up(x, m):
    return ((x + m - 1) // m) * m


def _const_spec(block_shape):
    """BlockSpec for a VMEM-resident operand whose block index never changes.

    Single-buffered (pl.Buffered(1)) to save VMEM; falls back to the default
    double-buffered spec if this JAX version does not expose pipeline_mode.
    """
    index_map = lambda i, s: (0,) * len(block_shape)
    try:
        return pl.BlockSpec(block_shape, index_map, pipeline_mode=pl.Buffered(1))
    except (TypeError, AttributeError):
        return pl.BlockSpec(block_shape, index_map)


def _fused_pool_head_kernel(emb_ref, w_ref, w1_ref, b1_ref, w2_ref, b2_ref,
                            out_ref, acc_ref):
    """Fused mask-weighted mean pooler + classifier head.

    Grid: (batch tiles, seq tiles).  Per step:
      emb_ref [TB, TS, D] bf16    w_ref  [TB, TS, 1] f32 (normalized mask weights)
      w1_ref  [D, Hp]     bf16    b1_ref [1, Hp]     f32
      w2_ref  [Hp, Cp]    bf16    b2_ref [1, Cp]     f32
      out_ref [TB, Cp]    f32     acc_ref [TB, D]    f32 scratch (pooled-sum accumulator)
    dropout(p=0.1) is identity in eval mode, so it is omitted.
    """
    s = pl.program_id(1)

    @pl.when(s == 0)
    def _():
        acc_ref[...] = jnp.zeros_like(acc_ref)

    # bf16 over the DMA, f32 accumulation (VPU mul + XLU sublane reduce).
    emb = emb_ref[...].astype(jnp.float32)                      # [TB, TS, D]
    acc_ref[...] += jnp.sum(emb * w_ref[...], axis=1)           # [TB, D] f32

    @pl.when(s == pl.num_programs(1) - 1)
    def _():
        pooled = jnp.tanh(acc_ref[...])                         # [TB, D] f32 (EUP)
        # fc1 -> relu -> fc2 on the MXU: bf16 operands, f32 accumulation, lane-dense Hp/Cp.
        h = jnp.dot(pooled.astype(jnp.bfloat16), w1_ref[...],
                    preferred_element_type=jnp.float32) + b1_ref[...]
        h = jnp.maximum(h, 0.0)
        out = jnp.dot(h.astype(jnp.bfloat16), w2_ref[...],
                      preferred_element_type=jnp.float32) + b2_ref[...]
        out_ref[...] = out.astype(out_ref.dtype)                # unmasked lane-dense store


@functools.partial(jax.jit, static_argnames=("num_classes", "tb", "ts"))
def text_classifier_forward(input_ids, attention_mask, emb_table, w1, b1, w2, b2,
                            *, num_classes, tb=256, ts=128):
    """input_ids [B,S] int32, attention_mask [B,S] {0,1}, emb_table [V,D],
    w1 [D,H], b1 [H], w2 [H,C], b2 [C].  Returns logits [B, num_classes] f32.

    tb: batch tile target (256 for v6e/v7x, use 128 on v5e).
    ts: sequence tile target (multiple of 8 dividing S, else full S is used).
    """
    B, S = input_ids.shape
    D = emb_table.shape[1]
    H = w1.shape[1]
    C = num_classes

    # Backbone stand-in: embedding gather in plain JAX (fuses under jit), bf16 over HBM.
    emb = emb_table[input_ids].astype(jnp.bfloat16)                    # [B, S, D]

    # Precomputed normalized mask weights: removes the in-kernel denom reduce + divide.
    mask_f = attention_mask.astype(jnp.float32)
    denom = jnp.maximum(jnp.sum(mask_f, axis=1, keepdims=True), 1.0)
    wnorm = (mask_f / denom)[:, :, None]                               # [B, S, 1] f32

    # Lane-dense padding of the *head* dims only (zero padding is exact); emb's D is NOT
    # padded in HBM (full-dim block is legal), avoiding an extra HBM pass.
    Hp = _round_up(H, LANE)
    Cp = _round_up(C, LANE)
    TB = _round_up(min(tb, max(B, 1)), SUBLANE)
    Bp = _round_up(B, TB)
    TS = ts if (S % ts == 0 and ts % SUBLANE == 0) else S

    emb_p = jnp.pad(emb, ((0, Bp - B), (0, 0), (0, 0)))
    w_p = jnp.pad(wnorm, ((0, Bp - B), (0, 0), (0, 0)))
    w1_p = jnp.pad(w1.astype(jnp.bfloat16), ((0, 0), (0, Hp - H)))
    b1_p = jnp.pad(b1.astype(jnp.float32).reshape(1, -1), ((0, 0), (0, Hp - H)))
    w2_p = jnp.pad(w2.astype(jnp.bfloat16), ((0, Hp - H), (0, Cp - C)))
    b2_p = jnp.pad(b2.astype(jnp.float32).reshape(1, -1), ((0, 0), (0, Cp - C)))

    # VMEM footprint estimate (double-buffered activations + weights + out + accumulator).
    # Only raise the scoped-VMEM limit above the 32 MiB default when actually needed, and
    # cap below v7x's 64 MiB physical VMEM.
    est = (2 * TB * TS * D * 2 + 2 * TB * TS * 4
           + 2 * (D * Hp + Hp * Cp) * 2 + 2 * (Hp + Cp) * 4
           + 2 * TB * Cp * 4 + TB * max(D, LANE) * 4)
    vmem_limit = None if est <= 32 * 1024 * 1024 else min(int(est * 1.25), 56 * 1024 * 1024)

    out_p = pl.pallas_call(
        _fused_pool_head_kernel,
        out_shape=jax.ShapeDtypeStruct((Bp, Cp), jnp.float32),
        grid=(Bp // TB, S // TS),
        in_specs=[
            pl.BlockSpec((TB, TS, D), lambda i, s: (i, s, 0)),   # activations (bf16)
            pl.BlockSpec((TB, TS, 1), lambda i, s: (i, s, 0)),   # normalized mask weights
            _const_spec((D, Hp)),                                # w1 (VMEM-resident)
            _const_spec((1, Hp)),                                # b1
            _const_spec((Hp, Cp)),                               # w2
            _const_spec((1, Cp)),                                # b2
        ],
        out_specs=pl.BlockSpec((TB, Cp), lambda i, s: (i, 0)),   # lane-dense output slab
        scratch_shapes=[pltpu.VMEM((TB, D), jnp.float32)],       # pooled-sum accumulator
        compiler_params=pltpu.CompilerParams(
            dimension_semantics=("parallel", "arbitrary"),       # batch sharded on megacore
            vmem_limit_bytes=vmem_limit),
    )(emb_p, w_p, w1_p, b1_p, w2_p, b2_p)

    return out_p[:B, :C]


def init_params(key, vocab_size, input_dim, num_classes):
    """Deterministic parameter init (PyTorch Linear-style uniform bounds)."""
    hidden = input_dim // 2
    k_emb, k_w1, k_b1, k_w2, k_b2 = jax.random.split(key, 5)
    emb_table = jax.random.normal(k_emb, (vocab_size, input_dim), jnp.float32) * 0.02
    bound1 = 1.0 / (input_dim ** 0.5)
    w1 = jax.random.uniform(k_w1, (input_dim, hidden), jnp.float32, -bound1, bound1)
    b1 = jax.random.uniform(k_b1, (hidden,), jnp.float32, -bound1, bound1)
    bound2 = 1.0 / (hidden ** 0.5)
    w2 = jax.random.uniform(k_w2, (hidden, num_classes), jnp.float32, -bound2, bound2)
    b2 = jax.random.uniform(k_b2, (num_classes,), jnp.float32, -bound2, bound2)
    return emb_table, w1, b1, w2, b2


if __name__ == "__main__":
    # Small shapes consistent with the module: batch=16, seq=8, input_dim=32,
    # hidden=input_dim//2=16, num_classes=4, vocab=50.
    B, S, D, C, V = 16, 8, 32, 4, 50

    key = jax.random.PRNGKey(0)
    k_ids, k_len, k_params = jax.random.split(key, 3)

    input_ids = jax.random.randint(k_ids, (B, S), 0, V, dtype=jnp.int32)
    lengths = jax.random.randint(k_len, (B,), 1, S + 1, dtype=jnp.int32)
    attention_mask = (jnp.arange(S)[None, :] < lengths[:, None]).astype(jnp.int32)

    emb_table, w1, b1, w2, b2 = init_params(k_params, V, D, C)

    logits = text_classifier_forward(input_ids, attention_mask, emb_table,
                                     w1, b1, w2, b2, num_classes=C, tb=256, ts=128)
    logits = jax.block_until_ready(logits)

    # Plain-JAX reference mirroring the kernel's dtype policy (bf16 operands, f32 accum).
    emb_bf = emb_table[input_ids].astype(jnp.bfloat16)
    mask_f = attention_mask.astype(jnp.float32)
    wnorm = mask_f / jnp.maximum(jnp.sum(mask_f, axis=1, keepdims=True), 1.0)
    pooled = jnp.tanh(jnp.sum(emb_bf.astype(jnp.float32) * wnorm[..., None], axis=1))
    h = jnp.maximum(jnp.dot(pooled.astype(jnp.bfloat16), w1.astype(jnp.bfloat16),
                            preferred_element_type=jnp.float32) + b1, 0.0)
    ref = jnp.dot(h.astype(jnp.bfloat16), w2.astype(jnp.bfloat16),
                  preferred_element_type=jnp.float32) + b2

    assert logits.shape == (B, C)
    max_err = float(jnp.max(jnp.abs(logits - ref)))
    assert jnp.allclose(logits, ref, atol=1e-4, rtol=1e-4), max_err

    print("KERNEL_OK")
</pallas_src>

<mosaic_0001>
module attributes {stable_mosaic.version = 11 : i64} {
  func.func @_fused_pool_head_kernel(%arg0: i32, %arg1: i32, %arg2: memref<16x8x32xbf16, #tpu.memory_space<vmem>>, %arg3: memref<16x8x1xf32, #tpu.memory_space<vmem>>, %arg4: memref<32x128xbf16, #tpu.memory_space<vmem>>, %arg5: memref<1x128xf32, #tpu.memory_space<vmem>>, %arg6: memref<128x128xbf16, #tpu.memory_space<vmem>>, %arg7: memref<1x128xf32, #tpu.memory_space<vmem>>, %arg8: memref<16x128xf32, #tpu.memory_space<vmem>>, %arg9: memref<16x32xf32, #tpu.memory_space<vmem>>) attributes {dimension_semantics = [#tpu.dimension_semantics<parallel>, #tpu.dimension_semantics<arbitrary>], iteration_bounds = array<i64: 1, 1>, scalar_prefetch = 0 : i64, scratch_operands = 1 : i64, tpu.core_type = #tpu.core_type<tc>, window_params = [{transform_indices = @transform_0, window_bounds = array<i64: 16, 8, 32>}, {transform_indices = @transform_1, window_bounds = array<i64: 16, 8, 1>}, {pipeline_mode = #tpu.pipeline_mode<synchronous>, transform_indices = @transform_2, window_bounds = array<i64: 32, 128>}, {pipeline_mode = #tpu.pipeline_mode<synchronous>, transform_indices = @transform_3, window_bounds = array<i64: 1, 128>}, {pipeline_mode = #tpu.pipeline_mode<synchronous>, transform_indices = @transform_4, window_bounds = array<i64: 128, 128>}, {pipeline_mode = #tpu.pipeline_mode<synchronous>, transform_indices = @transform_5, window_bounds = array<i64: 1, 128>}, {transform_indices = @transform_6, window_bounds = array<i64: 16, 128>}]} {
    %c0_i32 = arith.constant 0 : i32
    %0 = arith.cmpi eq, %arg1, %c0_i32 : i32
    %1 = arith.extui %0 : i1 to i32
    %c0_i32_0 = arith.constant 0 : i32
    %2 = arith.cmpi ne, %1, %c0_i32_0 : i32
    scf.if %2 {
      %cst_12 = arith.constant 0.000000e+00 : f32
      %15 = vector.broadcast %cst_12 : f32 to vector<16x32xf32>
      %c0_13 = arith.constant 0 : index
      %c0_14 = arith.constant 0 : index
      %16 = vector.load %arg9[%c0_13, %c0_14] : memref<16x32xf32, #tpu.memory_space<vmem>>, vector<16x32xf32>
      tpu.vector_store %arg9[%c0_13, %c0_14], %15 {strides = array<i32>} : memref<16x32xf32, #tpu.memory_space<vmem>>, vector<16x32xf32>,
    } else {
    }
    %c0 = arith.constant 0 : index
    %c0_1 = arith.constant 0 : index
    %c0_2 = arith.constant 0 : index
    %3 = vector.load %arg2[%c0, %c0_1, %c0_2] : memref<16x8x32xbf16, #tpu.memory_space<vmem>>, vector<16x8x32xbf16>
    %4 = arith.extf %3 : vector<16x8x32xbf16> to vector<16x8x32xf32>
    %c0_3 = arith.constant 0 : index
    %c0_4 = arith.constant 0 : index
    %5 = vector.load %arg9[%c0_3, %c0_4] : memref<16x32xf32, #tpu.memory_space<vmem>>, vector<16x32xf32>
    %c0_5 = arith.constant 0 : index
    %c0_6 = arith.constant 0 : index
    %c0_7 = arith.constant 0 : index
    %6 = vector.load %arg3[%c0_5, %c0_6, %c0_7] : memref<16x8x1xf32, #tpu.memory_space<vmem>>, vector<16x8x1xf32>
    %7 = vector.broadcast %6 : vector<16x8x1xf32> to vector<16x8x32xf32>
    %8 = arith.mulf %4, %7 : vector<16x8x32xf32>
    %cst = arith.constant dense<0.000000e+00> : vector<16x32xf32>
    %9 = vector.multi_reduction <add>, %8, %cst [1] : vector<16x8x32xf32> to vector<16x32xf32>
    %10 = arith.addf %5, %9 : vector<16x32xf32>
    %c0_8 = arith.constant 0 : index
    %c0_9 = arith.constant 0 : index
    %11 = vector.load %arg9[%c0_8, %c0_9] : memref<16x32xf32, #tpu.memory_space<vmem>>, vector<16x32xf32>
    tpu.vector_store %arg9[%c0_8, %c0_9], %10 {strides = array<i32>} : memref<16x32xf32, #tpu.memory_space<vmem>>, vector<16x32xf32>,
    %c0_i32_10 = arith.constant 0 : i32
    %12 = arith.cmpi eq, %arg1, %c0_i32_10 : i32
    %13 = arith.extui %12 : i1 to i32
    %c0_i32_11 = arith.constant 0 : i32
    %14 = arith.cmpi ne, %13, %c0_i32_11 : i32
    scf.if %14 {
      %c0_12 = arith.constant 0 : index
      %c0_13 = arith.constant 0 : index
      %15 = vector.load %arg9[%c0_12, %c0_13] : memref<16x32xf32, #tpu.memory_space<vmem>>, vector<16x32xf32>
      %16 = math.tanh %15 : vector<16x32xf32>
      %17 = arith.truncf %16 : vector<16x32xf32> to vector<16x32xbf16>
      %c0_14 = arith.constant 0 : index
      %c0_15 = arith.constant 0 : index
      %18 = vector.load %arg4[%c0_14, %c0_15] : memref<32x128xbf16, #tpu.memory_space<vmem>>, vector<32x128xbf16>
      %cst_16 = arith.constant dense<0.000000e+00> : vector<16x128xf32>
      %19 = tpu.matmul %17, %18, %cst_16 {dimension_numbers = #tpu.dot_dimension_numbers<[1], [0], [0], [1], [0, 0, 1, 1], [], []>} : vector<16x32xbf16>, vector<32x128xbf16>, vector<16x128xf32> -> vector<16x128xf32>
      %c0_17 = arith.constant 0 : index
      %c0_18 = arith.constant 0 : index
      %20 = vector.load %arg5[%c0_17, %c0_18] : memref<1x128xf32, #tpu.memory_space<vmem>>, vector<1x128xf32>
      %21 = vector.broadcast %20 : vector<1x128xf32> to vector<16x128xf32>
      %22 = arith.addf %19, %21 : vector<16x128xf32>
      %cst_19 = arith.constant 0.000000e+00 : f32
      %23 = vector.broadcast %cst_19 : f32 to vector<16x128xf32>
      %24 = arith.maximumf %22, %23 : vector<16x128xf32>
      %25 = arith.truncf %24 : vector<16x128xf32> to vector<16x128xbf16>
      %c0_20 = arith.constant 0 : index
      %c0_21 = arith.constant 0 : index
      %26 = vector.load %arg6[%c0_20, %c0_21] : memref<128x128xbf16, #tpu.memory_space<vmem>>, vector<128x128xbf16>
      %cst_22 = arith.constant dense<0.000000e+00> : vector<16x128xf32>
      %27 = tpu.matmul %25, %26, %cst_22 {dimension_numbers = #tpu.dot_dimension_numbers<[1], [0], [0], [1], [0, 0, 1, 1], [], []>} : vector<16x128xbf16>, vector<128x128xbf16>, vector<16x128xf32> -> vector<16x128xf32>
      %c0_23 = arith.constant 0 : index
      %c0_24 = arith.constant 0 : index
      %28 = vector.load %arg7[%c0_23, %c0_24] : memref<1x128xf32, #tpu.memory_space<vmem>>, vector<1x128xf32>
      %29 = vector.broadcast %28 : vector<1x128xf32> to vector<16x128xf32>
      %30 = arith.addf %27, %29 : vector<16x128xf32>
      %c0_25 = arith.constant 0 : index
      %c0_26 = arith.constant 0 : index
      %31 = vector.load %arg8[%c0_25, %c0_26] : memref<16x128xf32, #tpu.memory_space<vmem>>, vector<16x128xf32>
      tpu.vector_store %arg8[%c0_25, %c0_26], %30 {strides = array<i32>} : memref<16x128xf32, #tpu.memory_space<vmem>>, vector<16x128xf32>,
    } else {
    }
    return
  }
  func.func @transform_0(%arg0: i32, %arg1: i32) -> (i32, i32, i32) {
    %c0_i32 = arith.constant 0 : i32
    %c0_i32_0 = arith.constant 0 : i32
    return %arg0, %arg1, %c0_i32 : i32, i32, i32
  }
  func.func @transform_1(%arg0: i32, %arg1: i32) -> (i32, i32, i32) {
    %c0_i32 = arith.constant 0 : i32
    %c0_i32_0 = arith.constant 0 : i32
    return %arg0, %arg1, %c0_i32 : i32, i32, i32
  }
  func.func @transform_2(%arg0: i32, %arg1: i32) -> (i32, i32) {
    %c0_i32 = arith.constant 0 : i32
    %c0_i32_0 = arith.constant 0 : i32
    %c0_i32_1 = arith.constant 0 : i32
    return %c0_i32, %c0_i32_0 : i32, i32
  }
  func.func @transform_3(%arg0: i32, %arg1: i32) -> (i32, i32) {
    %c0_i32 = arith.constant 0 : i32
    %c0_i32_0 = arith.constant 0 : i32
    %c0_i32_1 = arith.constant 0 : i32
    return %c0_i32, %c0_i32_0 : i32, i32
  }
  func.func @transform_4(%arg0: i32, %arg1: i32) -> (i32, i32) {
    %c0_i32 = arith.constant 0 : i32
    %c0_i32_0 = arith.constant 0 : i32
    %c0_i32_1 = arith.constant 0 : i32
    return %c0_i32, %c0_i32_0 : i32, i32
  }
  func.func @transform_5(%arg0: i32, %arg1: i32) -> (i32, i32) {
    %c0_i32 = arith.constant 0 : i32
    %c0_i32_0 = arith.constant 0 : i32
    %c0_i32_1 = arith.constant 0 : i32
    return %c0_i32, %c0_i32_0 : i32, i32
  }
  func.func @transform_6(%arg0: i32, %arg1: i32) -> (i32, i32) {
    %c0_i32 = arith.constant 0 : i32
    %c0_i32_0 = arith.constant 0 : i32
    return %arg0, %c0_i32 : i32, i32
  }
}

</mosaic_0001>

<bundles_post_ra>
// kernel: text_classifier_forward.1
= control target key start
LH: loop header
LB: loop body
LE: loop exit
PB: predicated region body
PF: predicated region fallthrough
CT: control target
= control target key end

     0   :  { %v640_v0 = vmov 0   ;;  %vm28_vm0 = vcmask 261120   ;;  %v641_v17 = vmov 0.0   ;;  %vm642_vm1 = vmmov 0   ;;  %s859_s1 = inlined_call_operand.vmem [shape: f32[16,8,1], index: 1, kind: input, shape index: {}]   ;;  %s860_s2 = inlined_call_operand.vmem [shape: bf16[32,128], index: 2, kind: input, shape index: {}]   ;;  %s861_s4 = inlined_call_operand.vmem [shape: bf16[128,128], index: 4, kind: input, shape index: {}]   ;;  %s862_s0 = inlined_call_operand.vmem [shape: bf16[16,8,32], index: 0, kind: input, shape index: {}]   ;;  %s863_s3 = inlined_call_operand.vmem [shape: f32[1,128], index: 3, kind: input, shape index: {}]   ;;  %s864_s5 = inlined_call_operand.vmem [shape: f32[1,128], index: 5, kind: input, shape index: {}]   ;;  %s865_s6 = inlined_call_operand.vmem [shape: f32[16,128], index: 6, kind: output, shape index: {}]  }
   0x1   :  { %625 = vset.pattern.permute.xlu1 %v640_v0  ;;  %624 = vset.pattern.permute.xlu0 %v640_v0  ;;  %v73_v1 = vld [vmem:[%s859_s1 + $0x40] sm:$0xff]  ;;  %v74_v3 = vld [vmem:[%s859_s1 + $0x48] sm:$0xff]  ;;  %v75_v5 = vld [vmem:[%s859_s1 + $0x50] sm:$0xff]  ;;  %30 = vst.msk [vmem:[#allocation2 + $0x8] sm:$0xff] %vm28_vm0, %v641_v17  ;;  %vm306_vm2 = vcmask 1041409   ;;  %vm308_vm3 = vcmask 1042434  }
   0x2   :  { %v65_v2 = vld [vmem:[%s859_s1] sm:$0xff]  ;;  %123 = vperm.xlu1 %625, %v73_v1   ;;  %v66_v4 = vld [vmem:[%s859_s1 + $0x8] sm:$0xff]  ;;  %v67_v6 = vld [vmem:[%s859_s1 + $0x10] sm:$0xff]  ;;  %29 = vst.msk [vmem:[#allocation2] sm:$0xff] %vm28_vm0, %v641_v17  ;;  %593 = vmatprep.subr.bf16.mxu0 %v641_v17  ;;  %vm310_vm4 = vcmask 1043459   ;;  %vm312_vm5 = vcmask 1044484  }
   0x3   :  { %83 = vperm.xlu0 %624, %v65_v2   ;;  %v76_v7 = vld [vmem:[%s859_s1 + $0x58] sm:$0xff]  ;;  %v77_v9 = vld [vmem:[%s859_s1 + $0x60] sm:$0xff]  ;;  %v78_v11 = vld [vmem:[%s859_s1 + $0x68] sm:$0xff]  ;;  %601 = vmatprep.subr.bf16.mxu1 %v641_v17  ;;  %vm314_vm6 = vcmask 1045509   ;;  %vm316_vm7 = vcmask 1046534   ;;  %vm318_vm8 = vcmask 1047559  }
   0x4   :  { %v68_v8 = vld [vmem:[%s859_s1 + $0x18] sm:$0xff]  ;;  %v69_v10 = vld [vmem:[%s859_s1 + $0x20] sm:$0xff]  ;;  %v70_v12 = vld [vmem:[%s859_s1 + $0x28] sm:$0xff]  ;;  %597 = vmatprep.mubr.msk.bf16.mxu0 %vm642_vm1, %v641_v17  ;;  %617 = vmatprep.mubr.msk.bf16.mxu1 %vm642_vm1, %v641_v17 }
   0x5   :  { %v79_v13 = vld [vmem:[%s859_s1 + $0x70] sm:$0xff]  ;;  %v80_v15 = vld [vmem:[%s859_s1 + $0x78] sm:$0xff]  ;;  %v626_v18 = vld [vmem:[%s860_s2] sm:$0xff]  }
   0x6   :  { %128 = vperm.xlu1 %625, %v74_v3   ;;  %v71_v14 = vld [vmem:[%s859_s1 + $0x30] sm:$0xff]  ;;  %v72_v16 = vld [vmem:[%s859_s1 + $0x38] sm:$0xff]  ;;  %594 = vmatpush3.bf16.msra.mxu0 %v626_v18  ;;  %v627_v19 = vld [vmem:[%s860_s2 + $0x8] sm:$0xff]  }
   0x7   :  { %88 = vperm.xlu0 %624, %v66_v4   ;;  %595 = vmatprep.subr.bf16.mxu0 %v641_v17  ;;  %v628_v20 = vld [vmem:[%s861_s4] sm:$0xff]   ;;  %v629_v21 = vld [vmem:[%s861_s4 + $0x8] sm:$0xff]   ;;  %v630_v22 = vld [vmem:[%s861_s4 + $0x10] sm:$0xff]  }
   0x8   :  { %602 = vmatpush3.bf16.msra.mxu1 %v628_v20  ;;  %v631_v23 = vld [vmem:[%s861_s4 + $0x18] sm:$0xff]   ;;  %v632_v24 = vld [vmem:[%s861_s4 + $0x20] sm:$0xff]   ;;  %v633_v25 = vld [vmem:[%s861_s4 + $0x28] sm:$0xff]  }
   0x9   :  { %603 = vmatprep.subr.bf16.mxu1 %v641_v17  ;;  %v577_v26 = vld [vmem:[%s862_s0 + $0x20] sm:$0xff]   ;;  %v578_v38 = vld [vmem:[%s862_s0 + $0x28] sm:$0xff]   ;;  %v579_v62 = vld [vmem:[%s862_s0 + $0x30] sm:$0xff]  }
   0xa   :  { %133 = vperm.xlu1 %625, %v75_v5   ;;  %596 = vmatpush3.bf16.msra.mxu0 %v627_v19  ;;  %v543_v27 = vld [vmem:[%s862_s0] sm:$0xff]   ;;  %v560_v28 = vunpack.c.l.bf16 %v577_v26  ;;  %v561_v34 = vunpack.c.h.bf16 %v577_v26  ;;  %v574_v39 = vld [vmem:[%s862_s0 + $0x8] sm:$0xff]   ;;  %v564_v46 = vunpack.c.l.bf16 %v578_v38  ;;  %v565_v56 = vunpack.c.h.bf16 %v578_v38  ;;  %v575_v63 = vld [vmem:[%s862_s0 + $0x10] sm:$0xff]  }
   0xb   :  { %93 = vperm.xlu0 %624, %v67_v6   ;;  %v544_v29 = vunpack.c.l.bf16 %v543_v27  ;;  %v545_v35 = vunpack.c.h.bf16 %v543_v27  ;;  %v548_v47 = vunpack.c.l.bf16 %v574_v39  ;;  %v549_v57 = vunpack.c.h.bf16 %v574_v39 }
   0xc   :  { %604 = vmatpush3.bf16.msra.mxu1 %v629_v21  ;;  %v568_v6 = vunpack.c.l.bf16 %v579_v62  ;;  %v569_v27 = vunpack.c.h.bf16 %v579_v62 }
   0xd   :  { %605 = vmatprep.subr.bf16.mxu1 %v641_v17 }
   0xe   :  { %138 = vperm.xlu1 %625, %v76_v7   ;;  %v552_v7 = vunpack.c.l.bf16 %v575_v63 }
   0xf   :  { %98 = vperm.xlu0 %624, %v68_v8  }
  0x10   :  { %606 = vmatpush3.bf16.msra.mxu1 %v630_v22 }
  0x11   :  { %607 = vmatprep.subr.bf16.mxu1 %v641_v17 }
  0x12   :  { %143 = vperm.xlu1 %625, %v77_v9  }
  0x13   :  { %103 = vperm.xlu0 %624, %v69_v10  }
  0x14   :  { %608 = vmatpush3.bf16.msra.mxu1 %v631_v23  ;;  %v794_v23 = vld [vmem:[%s862_s0 + $0x38] sm:$0xff]  }
  0x15   :  { %609 = vmatprep.subr.bf16.mxu1 %v641_v17 }
  0x16   :  { %148 = vperm.xlu1 %625, %v78_v11  }
  0x17   :  { %108 = vperm.xlu0 %624, %v70_v12  }
  0x18   :  { %610 = vmatpush3.bf16.msra.mxu1 %v632_v24  ;;  %v799_v24 = vld [vmem:[%s862_s0 + $0x18] sm:$0xff]  }
  0x19   :  { %611 = vmatprep.subr.bf16.mxu1 %v641_v17  ;;  %v556_v38 = vunpack.c.l.bf16 %v799_v24 }
  0x1a   :  { %153 = vperm.xlu1 %625, %v79_v13  }
  0x1b   :  { %113 = vperm.xlu0 %624, %v71_v14  }
  0x1c   :  { %612 = vmatpush3.bf16.msra.mxu1 %v633_v25 }
  0x1d   :  { %613 = vmatprep.subr.bf16.mxu1 %v641_v17 }
  0x1e   :  { %158 = vperm.xlu1 %625, %v80_v15  }
  0x1f   :  { %118 = vperm.xlu0 %624, %v72_v16  }
  0x81   :  { %v124_v30 = vpop.permute.xlu1 %123 }
  0x82   :  { %v84_v31 = vpop.permute.xlu0 %83  ;;  %v169_v32 = vmul.f32 %v560_v28, %v124_v30  ;;  %v553_v28 = vunpack.c.h.bf16 %v575_v63 }
  0x83   :  { %v161_v33 = vmul.f32 %v544_v29, %v84_v31 }
  0x84   :  { %v234_v36 = vsel %vm28_vm0, %v169_v32, 0.0 }
  0x85   :  { %v178_v37 = vsel %vm28_vm0, %v161_v33, 0.0  ;;  %v235_v40 = vrot.slane %v234_v36, 4  ;;  %v129_v42 = vpop.permute.xlu1 %128 }
  0x86   :  { %v179_v41 = vrot.slane %v178_v37, 4  ;;  %v89_v43 = vpop.permute.xlu0 %88  ;;  %v170_v44 = vmul.f32 %v561_v34, %v129_v42 }
  0x87   :  { %v162_v45 = vmul.f32 %v545_v35, %v89_v43  ;;  %v236_v50 = vadd.f32 %v235_v40, %v234_v36 }
  0x88   :  { %v241_v48 = vsel %vm28_vm0, %v170_v44, 0.0  ;;  %v180_v51 = vadd.f32 %v179_v41, %v178_v37  ;;  %v572_v37 = vunpack.c.l.bf16 %v794_v23 }
  0x89   :  { %v185_v49 = vsel %vm28_vm0, %v162_v45, 0.0  ;;  %v242_v52 = vrot.slane %v241_v48, 4  ;;  %v134_v54 = vpop.permute.xlu1 %133  ;;  %v237_v0 = vrot.slane %v236_v50, 2 }
  0x8a   :  { %v186_v53 = vrot.slane %v185_v49, 4  ;;  %v94_v55 = vpop.permute.xlu0 %93  ;;  %v171_v60 = vmul.f32 %v564_v46, %v134_v54  ;;  %v181_v1 = vrot.slane %v180_v51, 2 }
  0x8b   :  { %v243_v58 = vadd.f32 %v242_v52, %v241_v48  ;;  %v163_v61 = vmul.f32 %v548_v47, %v94_v55  ;;  %v238_v12 = vadd.f32 %v237_v0, %v236_v50  ;;  %v557_v50 = vunpack.c.h.bf16 %v799_v24 }
  0x8c   :  { %v187_v59 = vadd.f32 %v186_v53, %v185_v49  ;;  %v248_v10 = vsel %vm28_vm0, %v171_v60, 0.0  ;;  %v182_v13 = vadd.f32 %v181_v1, %v180_v51  ;;  %v573_v49 = vunpack.c.h.bf16 %v794_v23 }
  0x8d   :  { %v139_v2 = vpop.permute.xlu1 %138  ;;  %v244_v8 = vrot.slane %v243_v58, 2  ;;  %v192_v11 = vsel %vm28_vm0, %v163_v61, 0.0  ;;  %v249_v19 = vrot.slane %v248_v10, 4  ;;  %v239_v33 = vrot.slane %v238_v12, 1 }
  0x8e   :  { %v99_v3 = vpop.permute.xlu0 %98  ;;  %v172_v4 = vmul.f32 %v565_v56, %v139_v2  ;;  %v188_v9 = vrot.slane %v187_v59, 2  ;;  %v193_v20 = vrot.slane %v192_v11, 4  ;;  %v183_v34 = vrot.slane %v182_v13, 1 }
  0x8f   :  { %v164_v5 = vmul.f32 %v549_v57, %v99_v3  ;;  %v245_v25 = vadd.f32 %v244_v8, %v243_v58  ;;  %v250_v39 = vadd.f32 %v249_v19, %v248_v10  ;;  %v809_v57 = vadd.f32 %v239_v33, %v238_v12 }
  0x90   :  { %v255_v14 = vsel %vm28_vm0, %v172_v4, 0.0  ;;  %v189_v26 = vadd.f32 %v188_v9, %v187_v59  ;;  %v194_v40 = vadd.f32 %v193_v20, %v192_v11  ;;  %v811_v58 = vadd.f32 %v183_v34, %v182_v13 }
  0x91   :  { %v199_v15 = vsel %vm28_vm0, %v164_v5, 0.0  ;;  %v144_v16 = vpop.permute.xlu1 %143  ;;  %v256_v29 = vrot.slane %v255_v14, 4  ;;  %v246_v43 = vrot.slane %v245_v25, 1  ;;  %v251_v59 = vrot.slane %v250_v39, 2 }
  0x92   :  { %v104_v18 = vpop.permute.xlu0 %103  ;;  %v173_v21 = vmul.f32 %v568_v6, %v144_v16  ;;  %v200_v30 = vrot.slane %v199_v15, 4  ;;  %v190_v44 = vrot.slane %v189_v26, 1  ;;  %v195_v60 = vrot.slane %v194_v40, 2 }
  0x93   :  { %v165_v22 = vmul.f32 %v552_v7, %v104_v18  ;;  %v257_v47 = vadd.f32 %v256_v29, %v255_v14  ;;  %v813_v61 = vadd.f32 %v246_v43, %v245_v25  ;;  %v252_v11 = vadd.f32 %v251_v59, %v250_v39 }
  0x94   :  { %v262_v31 = vsel %vm28_vm0, %v173_v21, 0.0  ;;  %v201_v48 = vadd.f32 %v200_v30, %v199_v15  ;;  %v815_v62 = vadd.f32 %v190_v44, %v189_v26  ;;  %v196_v12 = vadd.f32 %v195_v60, %v194_v40 }
  0x95   :  { %v206_v32 = vsel %vm28_vm0, %v165_v22, 0.0  ;;  %v149_v35 = vpop.permute.xlu1 %148  ;;  %v263_v41 = vrot.slane %v262_v31, 4  ;;  %v258_v1 = vrot.slane %v257_v47, 2 }
  0x96   :  { %v109_v36 = vpop.permute.xlu0 %108  ;;  %v207_v42 = vrot.slane %v206_v32, 4  ;;  %v174_v45 = vmul.f32 %v569_v27, %v149_v35  ;;  %v202_v2 = vrot.slane %v201_v48, 2  ;;  %v197_v33 = vrot.slane %v196_v12, 1 }
  0x97   :  { %v166_v46 = vmul.f32 %v553_v28, %v109_v36  ;;  %v264_v51 = vadd.f32 %v263_v41, %v262_v31  ;;  %v259_v20 = vadd.f32 %v258_v1, %v257_v47  ;;  %v307_v59 = vsel %vm306_vm2, %v815_v62, %v811_v58 }
  0x98   :  { %v208_v52 = vadd.f32 %v207_v42, %v206_v32  ;;  %v269_v53 = vsel %vm28_vm0, %v174_v45, 0.0  ;;  %v203_v21 = vadd.f32 %v202_v2, %v201_v48  ;;  %v253_v32 = vrot.slane %v252_v11, 1 }
  0x99   :  { %v213_v54 = vsel %vm28_vm0, %v166_v46, 0.0  ;;  %v154_v55 = vpop.permute.xlu1 %153  ;;  %v270_v63 = vrot.slane %v269_v53, 4  ;;  %v265_v5 = vrot.slane %v264_v51, 2  ;;  %v260_v36 = vrot.slane %v259_v20, 1 }
  0x9a   :  { %v114_v56 = vpop.permute.xlu0 %113  ;;  %v214_v0 = vrot.slane %v213_v54, 4  ;;  %v175_v3 = vmul.f32 %v572_v37, %v154_v55  ;;  %v209_v6 = vrot.slane %v208_v52, 2  ;;  %v204_v37 = vrot.slane %v203_v21, 1 }
  0x9b   :  { %v167_v4 = vmul.f32 %v556_v38, %v114_v56  ;;  %v271_v7 = vadd.f32 %v270_v63, %v269_v53  ;;  %v266_v24 = vadd.f32 %v265_v5, %v264_v51  ;;  %v254_v48 = vadd.f32 %v253_v32, %v252_v11 }
  0x9c   :  { %v215_v8 = vadd.f32 %v214_v0, %v213_v54  ;;  %v276_v13 = vsel %vm28_vm0, %v175_v3, 0.0  ;;  %v210_v25 = vadd.f32 %v209_v6, %v208_v52  ;;  %v261_v52 = vadd.f32 %v260_v36, %v259_v20 }
  0x9d   :  { %v159_v9 = vpop.permute.xlu1 %158  ;;  %v220_v14 = vsel %vm28_vm0, %v167_v4, 0.0  ;;  %v272_v15 = vrot.slane %v271_v7, 2  ;;  %v277_v18 = vrot.slane %v276_v13, 4  ;;  %v267_v40 = vrot.slane %v266_v24, 1 }
  0x9e   :  { %v119_v10 = vpop.permute.xlu0 %118  ;;  %v216_v16 = vrot.slane %v215_v8, 2  ;;  %v221_v19 = vrot.slane %v220_v14, 4  ;;  %v176_v22 = vmul.f32 %v573_v49, %v159_v9  ;;  %v211_v41 = vrot.slane %v210_v25, 1 }
  0x9f   :  { %v168_v23 = vmul.f32 %v557_v50, %v119_v10  ;;  %v278_v26 = vadd.f32 %v277_v18, %v276_v13  ;;  %v273_v28 = vadd.f32 %v272_v15, %v271_v7  ;;  %v198_v49 = vadd.f32 %v197_v33, %v196_v12  ;;  %v64_v12 = vld [vmem:[#allocation2 + $0x8] sm:$0xff] }
  0xa0   :  { %v222_v27 = vadd.f32 %v221_v19, %v220_v14  ;;  %v217_v29 = vadd.f32 %v216_v16, %v215_v8  ;;  %v283_v30 = vsel %vm28_vm0, %v176_v22, 0.0  ;;  %v205_v53 = vadd.f32 %v204_v37, %v203_v21  ;;  %v63_v14 = vld [vmem:[#allocation2] sm:$0xff] }
  0xa1   :  { %v227_v31 = vsel %vm28_vm0, %v168_v23, 0.0  ;;  %v279_v34 = vrot.slane %v278_v26, 2  ;;  %v284_v38 = vrot.slane %v283_v30, 4  ;;  %v274_v44 = vrot.slane %v273_v28, 1 }
  0xa2   :  { %v223_v35 = vrot.slane %v222_v27, 2  ;;  %v228_v39 = vrot.slane %v227_v31, 4  ;;  %v218_v45 = vrot.slane %v217_v29, 1  ;;  %v320_v56 = vsel %vm306_vm2, %v813_v61, %v809_v57 }
  0xa3   :  { %v280_v42 = vadd.f32 %v279_v34, %v278_v26  ;;  %v285_v46 = vadd.f32 %v284_v38, %v283_v30  ;;  %v268_v60 = vadd.f32 %v267_v40, %v266_v24  ;;  %v212_v63 = vadd.f32 %v211_v41, %v210_v25  ;;  %v529_v30 = vld [vmem:[%s863_s3] ss:$0 sm:$0xff] }
  0xa4   :  { %v224_v43 = vadd.f32 %v223_v35, %v222_v27  ;;  %v229_v47 = vadd.f32 %v228_v39, %v227_v31  ;;  %v275_v0 = vadd.f32 %v274_v44, %v273_v28  ;;  %v219_v1 = vadd.f32 %v218_v45, %v217_v29  ;;  %v634_v28 = vld [vmem:[%s861_s4 + $0x30] sm:$0xff]   ;;  %v635_v29 = vld [vmem:[%s861_s4 + $0x38] sm:$0xff]  }
  0xa5   :  { %v281_v50 = vrot.slane %v280_v42, 1  ;;  %v286_v54 = vrot.slane %v285_v46, 2  ;;  %v321_v4 = vsel %vm308_vm3, %v254_v48, %v320_v56  ;;  %v309_v5 = vsel %vm308_vm3, %v198_v49, %v307_v59  ;;  %614 = vmatpush3.bf16.msra.mxu1 %v634_v28 }
  0xa6   :  { %v225_v51 = vrot.slane %v224_v43, 1  ;;  %v230_v55 = vrot.slane %v229_v47, 2  ;;  %v322_v8 = vsel %vm310_vm4, %v261_v52, %v321_v4  ;;  %v311_v57 = vsel %vm310_vm4, %v205_v53, %v309_v5  ;;  %615 = vmatprep.subr.bf16.mxu1 %v641_v17  ;;  %v533_v17 = vld [vmem:[%s864_s5] ss:$0 sm:$0xff] }
  0xa7   :  { %v287_v2 = vadd.f32 %v286_v54, %v285_v46  ;;  %v282_v6 = vadd.f32 %v281_v50, %v280_v42  ;;  %v323_v58 = vsel %vm312_vm5, %v268_v60, %v322_v8  ;;  %v313_v62 = vsel %vm312_vm5, %v212_v63, %v311_v57 }
  0xa8   :  { %v231_v3 = vadd.f32 %v230_v55, %v229_v47  ;;  %v226_v7 = vadd.f32 %v225_v51, %v224_v43  ;;  %v324_v10 = vsel %vm314_vm6, %v275_v0, %v323_v58  ;;  %v315_v11 = vsel %vm314_vm6, %v219_v1, %v313_v62 }
  0xa9   :  { %v288_v61 = vrot.slane %v287_v2, 1  ;;  %v325_v16 = vsel %vm316_vm7, %v282_v6, %v324_v10  ;;  %616 = vmatpush3.bf16.msra.mxu1 %v635_v29 }
  0xaa   :  { %v232_v9 = vrot.slane %v231_v3, 1  ;;  %v317_v18 = vsel %vm316_vm7, %v226_v7, %v315_v11 }
  0xab   :  { %v289_v13 = vadd.f32 %v288_v61, %v287_v2 }
  0xac   :  { %v233_v15 = vadd.f32 %v232_v9, %v231_v3 }
  0xad   :  { %v326_v19 = vsel %vm318_vm8, %v289_v13, %v325_v16 }
  0xae   :  { %v319_v20 = vsel %vm318_vm8, %v233_v15, %v317_v18  ;;  %v330_v21 = vadd.f32 %v326_v19, %v64_v12 }
  0xaf   :  { %v329_v22 = vadd.f32 %v319_v20, %v63_v14 }
  0xb0   :  { %332 = vst.msk [vmem:[#allocation2 + $0x8] sm:$0xff] %vm28_vm0, %v330_v21 }
  0xb1   :  { %331 = vst.msk [vmem:[#allocation2] sm:$0xff] %vm28_vm0, %v329_v22 }
  0xb7   :  { %v337_v24 = vld [vmem:[#allocation2 + $0x8] sm:$0xff] }
  0xb8   :  { %v336_v23 = vld [vmem:[#allocation2] sm:$0xff] }
  0xb9   :  { %636 = vtanh.f32 %v336_v23 }
  0xba   :  { %638 = vtanh.f32 %v337_v24 }
  0xc3   :  { %v637_v25 = vpop.eup %636 }
  0xc4   :  { %v639_v26 = vpop.eup %638 }
  0xc5   :  { %v340_v27 = vpack.c.bf16 %v639_v26, %v637_v25 }
  0xc7   :  { %598 = vmatmul.mubr.msk.bf16.vlgmr.msra.gmra.mrb[0].mxu0 %vm28_vm0, %v340_v27 }
 0x19a   :  { %v401_v31 = vpop.f32.mrb[0].mxu0 }
 0x19b   :  { %v402_v32 = vadd.f32 %v529_v30, %v401_v31  ;;  %v599_v33 = vpop.f32.mrb[1].mxu0 }
 0x19c   :  { %v404_v34 = vpop.f32.mrb[2].mxu0 }
 0x19d   :  { %v405_v35 = vadd.f32 %v529_v30, %v404_v34  ;;  %v600_v36 = vpop.f32.mrb[3].mxu0  ;;  %v408_v37 = vmax.f32 %v402_v32, 0.0 }
 0x19f   :  { %v409_v38 = vmax.f32 %v405_v35, 0.0 }
 0x1a1   :  { %v410_v39 = vpack.c.bf16 %v409_v38, %v408_v37 }
 0x1a3   :  { %618 = vmatmul.mubr.bf16.vlgmr.msra.gmra.mrb[0].mxu1 %v410_v39 }
 0x276   :  { %v516_v40 = vpop.f32.mrb[0].mxu1 }
 0x277   :  { %v517_v41 = vadd.f32 %v533_v17, %v516_v40  ;;  %v619_v42 = vpop.f32.mrb[1].mxu1 }
 0x278   :  { %v519_v43 = vpop.f32.mrb[2].mxu1 }
 0x279   :  { %523 = vst [vmem:[%s865_s6] sm:$0xff] %v517_v41  ;;  %v520_v44 = vadd.f32 %v533_v17, %v519_v43  ;;  %v620_v45 = vpop.f32.mrb[3].mxu1 }
 0x27b   :  { %524 = vst [vmem:[%s865_s6 + $0x8] sm:$0xff] %v520_v44 }

</bundles_post_ra>
